<compile_context>
chip_gen: v5e
topology: v5e:2x2
jax: 0.10.0
libtpu: 0.0.40
codegen_flags: <defaults>
</compile_context>

<pallas_src>
import functools

import jax
import jax.numpy as jnp
from jax import lax
from jax.experimental import pallas as pl
from jax.experimental.pallas import tpu as pltpu


def _round_up(x: int, m: int) -> int:
    return ((x + m - 1) // m) * m


def _choose_tile_n(n: int, c: int, itemsize: int) -> int:
    """Pick a row-tile size from a VMEM working-set budget (multiple of 8)."""
    # Per-row bytes: 2 double-buffered native-dtype logits rows + ~5 f32
    # (row, C) temporaries (x_f32, exp(x-m), iota/compare, where-select, ...).
    per_row = c * (2 * itemsize + 5 * 4) + 256
    budget = 16 * 1024 * 1024                       # ~16 MiB working set
    tile = budget // per_row
    tile = max(8, min(int(tile), 2048))
    tile = min(tile, _round_up(n, 8))               # don't over-allocate tiny N
    tile = max(8, (tile // 8) * 8)                  # sublane rule: multiple of 8
    return tile


def _focal_loss_kernel(logits_ref, targets_ref, alpha_t_ref, out_ref, *,
                       gamma: float, n: int, tile_n: int):
    # Upcast in-kernel (inputs may be bf16); all math in f32.
    x = logits_ref[...].astype(jnp.float32)        # (TILE_N, C)
    t = targets_ref[...]                           # (TILE_N, 1) int32
    alpha_t = alpha_t_ref[...]                     # (TILE_N, 1) f32 (pre-gathered)

    # Numerically stable log-softmax -> per-sample cross entropy.
    m = jnp.max(x, axis=-1, keepdims=True)                                  # (TILE_N, 1)
    lse = m + jnp.log(jnp.sum(jnp.exp(x - m), axis=-1, keepdims=True))      # (TILE_N, 1)

    # Target-class logit via a select (no materialized float one-hot).
    col = lax.broadcasted_iota(jnp.int32, x.shape, 1)                       # (TILE_N, C)
    logit_t = jnp.sum(jnp.where(col == t, x, 0.0), axis=-1, keepdims=True)  # (TILE_N, 1)

    ce = lse - logit_t                                                      # = -log p_t
    pt = jnp.exp(-ce)                                                       # (TILE_N, 1)
    # Clamp: fp rounding can make pt exceed 1 by a few ULPs.
    one_minus_pt = jnp.maximum(1.0 - pt, 0.0)

    # Focal modulation, specialized on gamma (static Python value).
    if gamma == 0.0:
        mod = jnp.ones_like(one_minus_pt)
    elif float(gamma).is_integer():
        # Integer gamma (e.g. the default 2.0): pure VPU multiplies, no EUP pow.
        mod = lax.integer_pow(one_minus_pt, int(gamma))
    else:
        # Non-integer gamma: clamped log/exp (no NaN when 1-pt == 0).
        mod = jnp.exp(gamma * jnp.log(jnp.maximum(one_minus_pt, 1e-38)))

    focal = alpha_t * mod * ce                                              # (TILE_N, 1)

    # Mask rows beyond N (ragged last block: OOB reads are garbage, so this
    # MUST stay a jnp.where select, never a multiply-by-mask).
    row0 = pl.program_id(0) * tile_n
    row_ids = row0 + lax.broadcasted_iota(jnp.int32, focal.shape, 0)
    focal = jnp.where(row_ids < n, focal, 0.0)

    # Per-tile partial sum, replicated across a lane-dense (1, 128) block.
    out_ref[...] = jnp.broadcast_to(jnp.sum(focal), out_ref.shape)


def focal_loss(logits, targets, alpha=None, gamma: float = 2.0,
               reduction: str = "mean", tile_n=None):
    """Focal loss matching the PyTorch FocalLoss.forward semantics.

    logits:  (N, C) float (any float dtype; upcast to f32 in-kernel)
    targets: (N,)   integer class indices in [0, C)
    alpha:   optional (C,) per-class weights (None -> unweighted)
    reduction: 'mean' or 'sum'
    """
    n, c = logits.shape
    t = targets.astype(jnp.int32)

    # alpha[targets] gather done once in the wrapper (tiny N-element gather).
    if alpha is None:
        alpha_t = jnp.ones((n, 1), dtype=jnp.float32)
    else:
        alpha_t = jnp.asarray(alpha, dtype=jnp.float32)[t].reshape(n, 1)
    t2d = t.reshape(n, 1)

    # Tile size from VMEM budget (always a multiple of 8 sublanes).
    if tile_n is None:
        tile_n = _choose_tile_n(n, c, logits.dtype.itemsize)
    else:
        tile_n = max(8, _round_up(int(tile_n), 8))
        tile_n = min(tile_n, _round_up(n, 8))
    num_tiles = pl.cdiv(n, tile_n)

    kernel = functools.partial(
        _focal_loss_kernel, gamma=float(gamma), n=n, tile_n=tile_n)

    # Working set: double-buffered logits block + ~6 f32 (TILE_N, C) temps.
    working_bytes = tile_n * c * (2 * logits.dtype.itemsize + 6 * 4) + tile_n * 256
    vmem_limit = int(min(48 * 1024 * 1024,
                         max(16 * 1024 * 1024, 2 * working_bytes)))

    bytes_accessed = int(
        n * c * logits.dtype.itemsize    # logits (no pad copy)
        + n * 4                          # targets
        + n * 4                          # alpha_t
        + num_tiles * 128 * 4)           # partial-sum output

    partials = pl.pallas_call(
        kernel,
        out_shape=jax.ShapeDtypeStruct((num_tiles, 128), jnp.float32),
        grid_spec=pltpu.PrefetchScalarGridSpec(
            num_scalar_prefetch=0,
            grid=(num_tiles,),
            in_specs=[
                # logits: (TILE_N, C) block per grid step, double-buffered.
                pl.BlockSpec((tile_n, c), lambda i: (i, 0)),
                # targets: (TILE_N, 1) int32 column block.
                pl.BlockSpec((tile_n, 1), lambda i: (i, 0)),
                # pre-gathered alpha[targets]: (TILE_N, 1) f32 column block.
                pl.BlockSpec((tile_n, 1), lambda i: (i, 0)),
            ],
            # Lane-dense per-tile partial sums; each tile owns its own row.
            out_specs=pl.BlockSpec((1, 128), lambda i: (i, 0)),
        ),
        compiler_params=pltpu.CompilerParams(
            # Row tiles are independent -> shard across TensorCores (v7x: 2 TCs).
            dimension_semantics=("parallel",),
            vmem_limit_bytes=vmem_limit,
        ),
        cost_estimate=pl.CostEstimate(
            flops=8 * n * c,
            transcendentals=n * c + 4 * n,
            bytes_accessed=bytes_accessed,
        ),
    )(logits, t2d, alpha_t)

    total = jnp.sum(partials[:, 0])
    if reduction == "mean":
        return total / jnp.float32(n)
    if reduction == "sum":
        return total
    raise NotImplementedError("reduction='none' is not supported by the Pallas kernel")


if __name__ == "__main__":
    key = jax.random.PRNGKey(0)
    k1, k2, k3 = jax.random.split(key, 3)

    N, C = 8, 16  # small batch, 16 classes
    logits = jax.random.normal(k1, (N, C), dtype=jnp.float32)
    targets = jax.random.randint(k2, (N,), 0, C, dtype=jnp.int32)
    alpha = jax.random.uniform(k3, (C,), dtype=jnp.float32, minval=0.25, maxval=1.0)

    def ref_focal(lg, tg, al, gamma, reduction="mean"):
        lg32 = lg.astype(jnp.float32)
        logp = jax.nn.log_softmax(lg32, axis=-1)
        ce = -jnp.take_along_axis(logp, tg[:, None], axis=-1)[:, 0]
        pt = jnp.exp(-ce)
        w = jnp.ones_like(ce) if al is None else al[tg]
        fl = w * (1.0 - pt) ** gamma * ce
        return jnp.mean(fl) if reduction == "mean" else jnp.sum(fl)

    # 1) alpha-weighted, gamma=2.0 (integer fast path), reduction='mean'
    loss = jax.block_until_ready(focal_loss(logits, targets, alpha=alpha, gamma=2.0))
    ref = ref_focal(logits, targets, alpha, 2.0)
    assert jnp.allclose(loss, ref, rtol=1e-5, atol=1e-5), (loss, ref)

    # 2) alpha=None path (matches default FocalLoss())
    loss_na = jax.block_until_ready(focal_loss(logits, targets, alpha=None, gamma=2.0))
    ref_na = ref_focal(logits, targets, None, 2.0)
    assert jnp.allclose(loss_na, ref_na, rtol=1e-5, atol=1e-5), (loss_na, ref_na)

    # 3) non-integer gamma (clamped exp/log path)
    loss_g = jax.block_until_ready(focal_loss(logits, targets, alpha=alpha, gamma=1.5))
    ref_g = ref_focal(logits, targets, alpha, 1.5)
    assert jnp.allclose(loss_g, ref_g, rtol=1e-5, atol=1e-5), (loss_g, ref_g)

    # 4) multi-tile grid + ragged last block (no pad copy) + bf16 passthrough
    N2 = 20
    kk1, kk2 = jax.random.split(k1)
    logits2 = jax.random.normal(kk1, (N2, C), dtype=jnp.bfloat16)
    targets2 = jax.random.randint(kk2, (N2,), 0, C, dtype=jnp.int32)
    loss_mt = jax.block_until_ready(
        focal_loss(logits2, targets2, alpha=alpha, gamma=2.0, tile_n=8))
    ref_mt = ref_focal(logits2, targets2, alpha, 2.0)
    assert jnp.allclose(loss_mt, ref_mt, rtol=1e-5, atol=1e-5), (loss_mt, ref_mt)

    # 5) reduction='sum'
    loss_s = jax.block_until_ready(
        focal_loss(logits, targets, alpha=alpha, gamma=2.0, reduction="sum"))
    ref_s = ref_focal(logits, targets, alpha, 2.0, reduction="sum")
    assert jnp.allclose(loss_s, ref_s, rtol=1e-5, atol=1e-5), (loss_s, ref_s)

    print("KERNEL_OK")
</pallas_src>

<mosaic_0001>
module attributes {stable_mosaic.version = 11 : i64} {
  func.func @_focal_loss_kernel(%arg0: i32, %arg1: memref<8x16xf32, #tpu.memory_space<vmem>>, %arg2: memref<8x1xi32, #tpu.memory_space<vmem>>, %arg3: memref<8x1xf32, #tpu.memory_space<vmem>>, %arg4: memref<1x128xf32, #tpu.memory_space<vmem>>) attributes {dimension_semantics = [#tpu.dimension_semantics<parallel>], iteration_bounds = array<i64: 1>, scalar_prefetch = 0 : i64, scratch_operands = 0 : i64, tpu.core_type = #tpu.core_type<tc>, window_params = [{transform_indices = @transform_0, window_bounds = array<i64: 8, 16>}, {transform_indices = @transform_1, window_bounds = array<i64: 8, 1>}, {transform_indices = @transform_2, window_bounds = array<i64: 8, 1>}, {transform_indices = @transform_3, window_bounds = array<i64: 1, 128>}]} {
    %c0 = arith.constant 0 : index
    %c0_0 = arith.constant 0 : index
    %0 = vector.load %arg1[%c0, %c0_0] : memref<8x16xf32, #tpu.memory_space<vmem>>, vector<8x16xf32>
    %c0_1 = arith.constant 0 : index
    %c0_2 = arith.constant 0 : index
    %1 = vector.load %arg2[%c0_1, %c0_2] : memref<8x1xi32, #tpu.memory_space<vmem>>, vector<8x1xi32>
    %c0_3 = arith.constant 0 : index
    %c0_4 = arith.constant 0 : index
    %2 = vector.load %arg3[%c0_3, %c0_4] : memref<8x1xf32, #tpu.memory_space<vmem>>, vector<8x1xf32>
    %cst = arith.constant dense<0xFF800000> : vector<8xf32>
    %3 = vector.multi_reduction <maximumf>, %0, %cst [1] : vector<8x16xf32> to vector<8xf32>
    %4 = vector.shape_cast %3 : vector<8xf32> to vector<8x1xf32>
    %5 = vector.broadcast %4 : vector<8x1xf32> to vector<8x16xf32>
    %6 = arith.subf %0, %5 : vector<8x16xf32>
    %7 = math.exp %6 : vector<8x16xf32>
    %cst_5 = arith.constant dense<0.000000e+00> : vector<8xf32>
    %8 = vector.multi_reduction <add>, %7, %cst_5 [1] : vector<8x16xf32> to vector<8xf32>
    %9 = vector.shape_cast %8 : vector<8xf32> to vector<8x1xf32>
    %10 = math.log %9 : vector<8x1xf32>
    %11 = arith.addf %4, %10 : vector<8x1xf32>
    %12 = tpu.iota {dimensions = array<i32: 1>} : vector<8x16xi32>
    %13 = vector.broadcast %1 : vector<8x1xi32> to vector<8x16xi32>
    %14 = arith.cmpi eq, %12, %13 : vector<8x16xi32>
    %cst_6 = arith.constant 0.000000e+00 : f32
    %15 = vector.broadcast %cst_6 : f32 to vector<8x16xf32>
    %16 = arith.select %14, %0, %15 : vector<8x16xi1>, vector<8x16xf32>
    %cst_7 = arith.constant dense<0.000000e+00> : vector<8xf32>
    %17 = vector.multi_reduction <add>, %16, %cst_7 [1] : vector<8x16xf32> to vector<8xf32>
    %18 = vector.shape_cast %17 : vector<8xf32> to vector<8x1xf32>
    %19 = arith.subf %11, %18 : vector<8x1xf32>
    %cst_8 = arith.constant 0.000000e+00 : f32
    %20 = vector.broadcast %cst_8 : f32 to vector<8x1xf32>
    %21 = arith.subf %20, %19 : vector<8x1xf32>
    %22 = math.exp %21 : vector<8x1xf32>
    %cst_9 = arith.constant 1.000000e+00 : f32
    %23 = vector.broadcast %cst_9 : f32 to vector<8x1xf32>
    %24 = arith.subf %23, %22 : vector<8x1xf32>
    %cst_10 = arith.constant 0.000000e+00 : f32
    %25 = vector.broadcast %cst_10 : f32 to vector<8x1xf32>
    %26 = arith.maximumf %24, %25 : vector<8x1xf32>
    %27 = arith.mulf %26, %26 : vector<8x1xf32>
    %28 = arith.mulf %2, %27 : vector<8x1xf32>
    %29 = arith.mulf %28, %19 : vector<8x1xf32>
    %c8_i32 = arith.constant 8 : i32
    %30 = arith.muli %arg0, %c8_i32 : i32
    %31 = tpu.iota {dimensions = array<i32: 0>} : vector<8x1xi32>
    %32 = vector.broadcast %30 : i32 to vector<8x1xi32>
    %33 = arith.addi %32, %31 : vector<8x1xi32>
    %c8_i32_11 = arith.constant 8 : i32
    %34 = vector.broadcast %c8_i32_11 : i32 to vector<8x1xi32>
    %35 = arith.cmpi slt, %33, %34 : vector<8x1xi32>
    %cst_12 = arith.constant 0.000000e+00 : f32
    %36 = vector.broadcast %cst_12 : f32 to vector<8x1xf32>
    %37 = arith.select %35, %29, %36 : vector<8x1xi1>, vector<8x1xf32>
    %38 = vector.shape_cast %37 : vector<8x1xf32> to vector<1x8x1xf32>
    %cst_13 = arith.constant dense<0.000000e+00> : vector<1xf32>
    %39 = vector.multi_reduction <add>, %38, %cst_13 [1, 2] : vector<1x8x1xf32> to vector<1xf32>
    %40 = vector.shape_cast %39 : vector<1xf32> to vector<1x1x1xf32>
    %41 = vector.extract %40[0, 0, 0] : f32 from vector<1x1x1xf32>
    %42 = vector.broadcast %41 : f32 to vector<1x128xf32>
    %c0_14 = arith.constant 0 : index
    %c0_15 = arith.constant 0 : index
    %43 = vector.load %arg4[%c0_14, %c0_15] : memref<1x128xf32, #tpu.memory_space<vmem>>, vector<1x128xf32>
    tpu.vector_store %arg4[%c0_14, %c0_15], %42 {strides = array<i32>} : memref<1x128xf32, #tpu.memory_space<vmem>>, vector<1x128xf32>,
    return
  }
  func.func @transform_0(%arg0: i32) -> (i32, i32) {
    %c0_i32 = arith.constant 0 : i32
    %c0_i32_0 = arith.constant 0 : i32
    return %arg0, %c0_i32 : i32, i32
  }
  func.func @transform_1(%arg0: i32) -> (i32, i32) {
    %c0_i32 = arith.constant 0 : i32
    %c0_i32_0 = arith.constant 0 : i32
    return %arg0, %c0_i32 : i32, i32
  }
  func.func @transform_2(%arg0: i32) -> (i32, i32) {
    %c0_i32 = arith.constant 0 : i32
    %c0_i32_0 = arith.constant 0 : i32
    return %arg0, %c0_i32 : i32, i32
  }
  func.func @transform_3(%arg0: i32) -> (i32, i32) {
    %c0_i32 = arith.constant 0 : i32
    %c0_i32_0 = arith.constant 0 : i32
    return %arg0, %c0_i32 : i32, i32
  }
}

</mosaic_0001>

<bundles_post_ra>
// kernel: tpu_custom_call.1
= control target key start
LH: loop header
LB: loop body
LE: loop exit
PB: predicated region body
PF: predicated region fallthrough
CT: control target
= control target key end

     0   :  { %vm18_vm0 = vcmask 130048   ;;  %s160_s0 = inlined_call_operand.vmem [shape: f32[8,16], index: 0, kind: input, shape index: {}]   ;;  %s161_s1 = inlined_call_operand.vmem [shape: s32[8,1], index: 1, kind: input, shape index: {}]   ;;  %s162_s2 = inlined_call_operand.vmem [shape: f32[8,1], index: 2, kind: input, shape index: {}]   ;;  %s163_s3 = inlined_call_operand.hbm [shape: f32[1,128], index: 3, kind: output, shape index: {}]  }
   0x1   :  { %v15_v0 = vld [vmem:[%s160_s0] sm:$0xff] }
   0x2   :  { %8 = vsyncpa [#allocation3], 0  ;;  %v19_v1 = vsel %vm18_vm0, %v15_v0, -inf  ;;  %v123_v2 = vmov 0   ;;  %v16_v3 = vld [vmem:[%s161_s1] sm:$0xff]  ;;  %v31_v9 = vlaneseq  ;;  %vm57_vm2 = vcmask 7168  }
   0x3   :  { %90 = vset.pattern.permute.xlu0 %v123_v2  ;;  %v17_v25 = vld [vmem:[%s162_s2] sm:$0xff]  ;;  %s124_s16 = smov [#allocation2]   ;;  %s77_s2 = sshll.u32 %s163_s3, 4  ;;  %s78_s2 = int_to_ptr.hbm [resolvable:$true] %s77_s2 }
   0x4   :  { %20 = vmax.xlane.f32.xlu0 %v19_v1  ;;  %v32_v10 = vand.u32 127, %v31_v9  ;;  %s75_s17 = sshll.u32 %s124_s16, 4  ;;  %s76_s17 = int_to_ptr.vmem [resolvable:$true] %s75_s17 }
  0x18   :  { %34 = vperm.xlu0 %90, %v16_v3  }
  0x77   :  { %v21_v4 = vpop.xlane.xlu0 %20 }
  0x78   :  { %v22_v5 = vsub.f32 %v15_v0, %v21_v4 }
  0x7a   :  { %v23_v6 = vmul.f32 1.442695, %v22_v5 }
  0x7c   :  { %91 = vpow2.f32 %v23_v6 }
  0x82   :  { %v92_v7 = vpop.eup %91 }
  0x83   :  { %v25_v8 = vsel %vm18_vm0, %v92_v7, 0.0 }
  0x84   :  { %26 = vadd.xlane.f32.xlu1 %v25_v8 }
  0x8a   :  { %v35_v11 = vpop.permute.xlu0 %34 }
  0x8b   :  { %vm36_vm1 = vcmp.eq.s32.totalorder %v32_v10, %v35_v11 }
  0x8c   :  { %v37_v12 = vsel %vm36_vm1, %v15_v0, 0.0 }
  0x8d   :  { %v38_v13 = vsel %vm18_vm0, %v37_v12, 0.0 }
  0x8e   :  { %39 = vadd.xlane.f32.xlu1 %v38_v13 }
  0xf7   :  { %v27_v14 = vpop.xlane.xlu1 %26 }
  0xf8   :  { %93 = vlog2.f32 %v27_v14 }
  0xfe   :  { %v94_v15 = vpop.eup %93 }
  0xff   :  { %v29_v16 = vmul.f32 0.6931472, %v94_v15 }
 0x101   :  { %v30_v17 = vadd.f32 %v29_v16, %v21_v4  ;;  %v40_v18 = vpop.xlane.xlu1 %39 }
 0x103   :  { %v41_v19 = vsub.f32 %v30_v17, %v40_v18 }
 0x105   :  { %v42_v20 = vsub.f32 0.0, %v41_v19 }
 0x107   :  { %v43_v21 = vmul.f32 1.442695, %v42_v20 }
 0x109   :  { %95 = vpow2.f32 %v43_v21 }
 0x10f   :  { %v96_v22 = vpop.eup %95 }
 0x110   :  { %v45_v23 = vsub.f32 1.0, %v96_v22 }
 0x112   :  { %v46_v24 = vmax.f32 %v45_v23, 0.0 }
 0x114   :  { %v47_v26 = vmul.f32 %v46_v24, %v46_v24 }
 0x116   :  { %v48_v27 = vmul.f32 %v47_v26, %v17_v25 }
 0x118   :  { %v49_v28 = vmul.f32 %v48_v27, %v41_v19 }
 0x11a   :  { %v58_v29 = vsel %vm57_vm2, %v49_v28, 0.0 }
 0x11b   :  { %59 = vadd.xlane.f32.xlu2 %v58_v29 }
 0x18e   :  { %v60_v30 = vpop.xlane.xlu2 %59 }
 0x18f   :  { %v61_v31 = vrot.slane %v60_v30, 4 }
 0x191   :  { %v62_v32 = vadd.f32 %v61_v31, %v60_v30 }
 0x193   :  { %v63_v33 = vrot.slane %v62_v32, 2 }
 0x195   :  { %v64_v34 = vadd.f32 %v63_v33, %v62_v32 }
 0x197   :  { %v65_v35 = vrot.slane %v64_v34, 1 }
 0x199   :  { %v66_v36 = vadd.f32 %v65_v35, %v64_v34 }
 0x19b   :  { %86 = vpush %v66_v36 }
 0x1cc   :  { %s87_s20 = spop %86 }
 0x1cd   :  { %v68_v37 = vstv %s87_s20 }
 0x1ce   :  { %69 = vst [vmem:[#allocation2] sm:$0x1] %v68_v37 }
 0x1cf   :  { %80 = dma.vmem_to_hbm [thread:$0]  %s76_s17, 16, %s78_s2, [#allocation3]  }
 0x1d0   :  { %121 = dma.done.wait [#allocation3], 16  }
 0x1d1   :  { %122 = vsyncadd [#allocation3], 4294967280 }
 0x1d2   :  { %85 = vsyncpa [#allocation3], 1 }

</bundles_post_ra>
